<compile_context>
chip_gen: v7x
topology: tpu7x:2x2x1
jax: 0.10.0
libtpu: 0.0.40
codegen_flags: <defaults>
</compile_context>

<pallas_src>
import functools

import jax
import jax.numpy as jnp
from jax.experimental import pallas as pl
from jax.experimental.pallas import tpu as pltpu

FEATURES = 100  # hidden == in == out == 100, per the PyTorch module
LANE = 128      # TPU lane width: pad the feature dim to a multiple of this


def _round_up(x, m):
    return ((x + m - 1) // m) * m


def _mlp_kernel(x_ref, w1_ref, b1_ref, w2_ref, b2_ref, o_ref):
    # Layer 1: bf16 operands, f32 MXU accumulation; bias-add + ReLU in f32.
    h = jnp.dot(x_ref[...], w1_ref[...], preferred_element_type=jnp.float32)
    h = jnp.maximum(h + b1_ref[...], 0.0)
    # Layer 2: cast hidden back to the operand dtype for the MXU.
    y = jnp.dot(h.astype(w2_ref.dtype), w2_ref[...],
                preferred_element_type=jnp.float32)
    y = jnp.maximum(y + b2_ref[...], 0.0)
    o_ref[...] = y.astype(o_ref.dtype)


@functools.partial(jax.jit, static_argnames=("block_b", "compute_dtype"))
def toy_model_forward(x, w1, b1, w2, b2, *, block_b=256,
                      compute_dtype=jnp.bfloat16):
    """x: (B, 100) float32. w1/w2: (100, 100) stored (in, out). b1/b2: (100,).

    Returns relu(relu(x @ w1 + b1) @ w2 + b2) as float32 of shape (B, 100).
    """
    B, F = x.shape
    assert w1.shape == (F, F) and w2.shape == (F, F)

    # Lane-dense feature padding (100 -> 128); zero pad keeps math exact for
    # the first F output columns.
    f_pad = _round_up(F, LANE)
    # Batch tile: 256 rows by default (matches v6e/v7x 2x256^2 MXU; on v5e a
    # smaller batch just maps onto more 128-row passes). Clamp for tiny B so
    # the second-to-last block dim stays a multiple of 8 without huge padding.
    blk_b = min(block_b, _round_up(B, 8))
    b_pad = _round_up(B, blk_b)

    cd = compute_dtype
    x_p = jnp.zeros((b_pad, f_pad), cd).at[:B, :F].set(x.astype(cd))
    w1_p = jnp.zeros((f_pad, f_pad), cd).at[:F, :F].set(w1.astype(cd))
    w2_p = jnp.zeros((f_pad, f_pad), cd).at[:F, :F].set(w2.astype(cd))
    b1_p = jnp.zeros((1, f_pad), jnp.float32).at[0, :F].set(b1.astype(jnp.float32))
    b2_p = jnp.zeros((1, f_pad), jnp.float32).at[0, :F].set(b2.astype(jnp.float32))

    n_tiles = b_pad // blk_b

    itemsize = jnp.dtype(cd).itemsize
    bytes_accessed = (x_p.size * itemsize            # activations in
                      + (w1_p.size + w2_p.size) * itemsize  # weights (resident)
                      + (b1_p.size + b2_p.size) * 4         # biases
                      + b_pad * f_pad * 4)                   # output
    flops = 2 * 2 * b_pad * f_pad * f_pad  # two GEMMs

    vmem = pltpu.MemorySpace.VMEM
    out = pl.pallas_call(
        _mlp_kernel,
        out_shape=jax.ShapeDtypeStruct((b_pad, f_pad), jnp.float32),
        grid=(n_tiles,),
        in_specs=[
            # activations: one batch tile per grid step
            pl.BlockSpec((blk_b, f_pad), lambda i: (i, 0), memory_space=vmem),
            # weights / biases: constant index_map -> VMEM-resident, no re-DMA
            pl.BlockSpec((f_pad, f_pad), lambda i: (0, 0), memory_space=vmem),
            pl.BlockSpec((1, f_pad), lambda i: (0, 0), memory_space=vmem),
            pl.BlockSpec((f_pad, f_pad), lambda i: (0, 0), memory_space=vmem),
            pl.BlockSpec((1, f_pad), lambda i: (0, 0), memory_space=vmem),
        ],
        out_specs=pl.BlockSpec((blk_b, f_pad), lambda i: (i, 0),
                               memory_space=vmem),
        compiler_params=pltpu.CompilerParams(
            dimension_semantics=("parallel",)),
        cost_estimate=pl.CostEstimate(flops=flops, transcendentals=0,
                                      bytes_accessed=bytes_accessed),
    )(x_p, w1_p, b1_p, w2_p, b2_p)

    # Slice away batch / feature padding outside the kernel.
    return out[:B, :F]


def init_params(key, fan_in=FEATURES, fan_out=FEATURES):
    """Deterministic init mimicking nn.Linear's uniform(-1/sqrt(in), 1/sqrt(in))."""
    k1, k2, k3, k4 = jax.random.split(key, 4)
    bound = 1.0 / jnp.sqrt(jnp.float32(fan_in))
    # stored directly as (in, out) so the kernel does x @ W
    w1 = jax.random.uniform(k1, (fan_in, fan_out), jnp.float32, -bound, bound)
    b1 = jax.random.uniform(k2, (fan_out,), jnp.float32, -bound, bound)
    w2 = jax.random.uniform(k3, (fan_in, fan_out), jnp.float32, -bound, bound)
    b2 = jax.random.uniform(k4, (fan_out,), jnp.float32, -bound, bound)
    return w1, b1, w2, b2


def _reference_quantized(x, w1, b1, w2, b2, compute_dtype=jnp.bfloat16):
    """Same math as the kernel: bf16 operands, f32 accumulate/bias/ReLU."""
    q = lambda a: a.astype(compute_dtype).astype(jnp.float32)
    h = jnp.maximum(q(x) @ q(w1) + b1, 0.0)
    return jnp.maximum(q(h) @ q(w2) + b2, 0.0)


def _reference_f32(x, w1, b1, w2, b2):
    h = jnp.maximum(x @ w1 + b1, 0.0)
    return jnp.maximum(h @ w2 + b2, 0.0)


if __name__ == "__main__":
    key = jax.random.PRNGKey(0)
    kx, kp = jax.random.split(key)
    w1, b1, w2, b2 = init_params(kp)

    # Small-shape check (batch=8), single grid step.
    x_small = jax.random.normal(kx, (8, FEATURES), jnp.float32)
    out_small = jax.block_until_ready(toy_model_forward(x_small, w1, b1, w2, b2))
    assert out_small.shape == (8, FEATURES)
    ref_q = _reference_quantized(x_small, w1, b1, w2, b2)
    assert jnp.allclose(out_small, ref_q, atol=1e-3, rtol=1e-3), \
        "mismatch vs bf16-quantized reference (B=8)"
    # sanity vs full-f32 reference (looser: bf16 operand rounding)
    ref_f = _reference_f32(x_small, w1, b1, w2, b2)
    assert jnp.allclose(out_small, ref_f, atol=5e-2, rtol=5e-2), \
        "mismatch vs f32 reference (B=8)"

    # Larger batch exercises the parallel batch grid with resident weights.
    x_big = jax.random.normal(kx, (512, FEATURES), jnp.float32)
    out_big = jax.block_until_ready(toy_model_forward(x_big, w1, b1, w2, b2))
    assert out_big.shape == (512, FEATURES)
    ref_big = _reference_quantized(x_big, w1, b1, w2, b2)
    assert jnp.allclose(out_big, ref_big, atol=1e-3, rtol=1e-3), \
        "mismatch vs bf16-quantized reference (B=512)"

    print("KERNEL_OK")
</pallas_src>

<mosaic_0001>
module attributes {stable_mosaic.version = 11 : i64} {
  func.func @_mlp_kernel(%arg0: i32, %arg1: memref<8x128xbf16, #tpu.memory_space<vmem>>, %arg2: memref<128x128xbf16, #tpu.memory_space<vmem>>, %arg3: memref<1x128xf32, #tpu.memory_space<vmem>>, %arg4: memref<128x128xbf16, #tpu.memory_space<vmem>>, %arg5: memref<1x128xf32, #tpu.memory_space<vmem>>, %arg6: memref<8x128xf32, #tpu.memory_space<vmem>>) attributes {dimension_semantics = [#tpu.dimension_semantics<parallel>], iteration_bounds = array<i64: 1>, scalar_prefetch = 0 : i64, scratch_operands = 0 : i64, tpu.core_type = #tpu.core_type<tc>, window_params = [{transform_indices = @transform_0, window_bounds = array<i64: 8, 128>}, {pipeline_mode = #tpu.pipeline_mode<synchronous>, transform_indices = @transform_1, window_bounds = array<i64: 128, 128>}, {pipeline_mode = #tpu.pipeline_mode<synchronous>, transform_indices = @transform_2, window_bounds = array<i64: 1, 128>}, {pipeline_mode = #tpu.pipeline_mode<synchronous>, transform_indices = @transform_3, window_bounds = array<i64: 128, 128>}, {pipeline_mode = #tpu.pipeline_mode<synchronous>, transform_indices = @transform_4, window_bounds = array<i64: 1, 128>}, {transform_indices = @transform_5, window_bounds = array<i64: 8, 128>}]} {
    %c0 = arith.constant 0 : index
    %c0_0 = arith.constant 0 : index
    %0 = vector.load %arg1[%c0, %c0_0] : memref<8x128xbf16, #tpu.memory_space<vmem>>, vector<8x128xbf16>
    %c0_1 = arith.constant 0 : index
    %c0_2 = arith.constant 0 : index
    %1 = vector.load %arg2[%c0_1, %c0_2] : memref<128x128xbf16, #tpu.memory_space<vmem>>, vector<128x128xbf16>
    %cst = arith.constant dense<0.000000e+00> : vector<8x128xf32>
    %2 = tpu.matmul %0, %1, %cst {dimension_numbers = #tpu.dot_dimension_numbers<[1], [0], [0], [1], [0, 0, 1, 1], [], []>} : vector<8x128xbf16>, vector<128x128xbf16>, vector<8x128xf32> -> vector<8x128xf32>
    %c0_3 = arith.constant 0 : index
    %c0_4 = arith.constant 0 : index
    %3 = vector.load %arg3[%c0_3, %c0_4] : memref<1x128xf32, #tpu.memory_space<vmem>>, vector<1x128xf32>
    %4 = vector.broadcast %3 : vector<1x128xf32> to vector<8x128xf32>
    %5 = arith.addf %2, %4 : vector<8x128xf32>
    %cst_5 = arith.constant 0.000000e+00 : f32
    %6 = vector.broadcast %cst_5 : f32 to vector<8x128xf32>
    %7 = arith.maximumf %5, %6 : vector<8x128xf32>
    %8 = arith.truncf %7 : vector<8x128xf32> to vector<8x128xbf16>
    %c0_6 = arith.constant 0 : index
    %c0_7 = arith.constant 0 : index
    %9 = vector.load %arg4[%c0_6, %c0_7] : memref<128x128xbf16, #tpu.memory_space<vmem>>, vector<128x128xbf16>
    %cst_8 = arith.constant dense<0.000000e+00> : vector<8x128xf32>
    %10 = tpu.matmul %8, %9, %cst_8 {dimension_numbers = #tpu.dot_dimension_numbers<[1], [0], [0], [1], [0, 0, 1, 1], [], []>} : vector<8x128xbf16>, vector<128x128xbf16>, vector<8x128xf32> -> vector<8x128xf32>
    %c0_9 = arith.constant 0 : index
    %c0_10 = arith.constant 0 : index
    %11 = vector.load %arg5[%c0_9, %c0_10] : memref<1x128xf32, #tpu.memory_space<vmem>>, vector<1x128xf32>
    %12 = vector.broadcast %11 : vector<1x128xf32> to vector<8x128xf32>
    %13 = arith.addf %10, %12 : vector<8x128xf32>
    %cst_11 = arith.constant 0.000000e+00 : f32
    %14 = vector.broadcast %cst_11 : f32 to vector<8x128xf32>
    %15 = arith.maximumf %13, %14 : vector<8x128xf32>
    %c0_12 = arith.constant 0 : index
    %c0_13 = arith.constant 0 : index
    %16 = vector.load %arg6[%c0_12, %c0_13] : memref<8x128xf32, #tpu.memory_space<vmem>>, vector<8x128xf32>
    tpu.vector_store %arg6[%c0_12, %c0_13], %15 {strides = array<i32>} : memref<8x128xf32, #tpu.memory_space<vmem>>, vector<8x128xf32>,
    return
  }
  func.func @transform_0(%arg0: i32) -> (i32, i32) {
    %c0_i32 = arith.constant 0 : i32
    %c0_i32_0 = arith.constant 0 : i32
    return %arg0, %c0_i32 : i32, i32
  }
  func.func @transform_1(%arg0: i32) -> (i32, i32) {
    %c0_i32 = arith.constant 0 : i32
    %c0_i32_0 = arith.constant 0 : i32
    %c0_i32_1 = arith.constant 0 : i32
    return %c0_i32, %c0_i32_0 : i32, i32
  }
  func.func @transform_2(%arg0: i32) -> (i32, i32) {
    %c0_i32 = arith.constant 0 : i32
    %c0_i32_0 = arith.constant 0 : i32
    %c0_i32_1 = arith.constant 0 : i32
    return %c0_i32, %c0_i32_0 : i32, i32
  }
  func.func @transform_3(%arg0: i32) -> (i32, i32) {
    %c0_i32 = arith.constant 0 : i32
    %c0_i32_0 = arith.constant 0 : i32
    %c0_i32_1 = arith.constant 0 : i32
    return %c0_i32, %c0_i32_0 : i32, i32
  }
  func.func @transform_4(%arg0: i32) -> (i32, i32) {
    %c0_i32 = arith.constant 0 : i32
    %c0_i32_0 = arith.constant 0 : i32
    %c0_i32_1 = arith.constant 0 : i32
    return %c0_i32, %c0_i32_0 : i32, i32
  }
  func.func @transform_5(%arg0: i32) -> (i32, i32) {
    %c0_i32 = arith.constant 0 : i32
    %c0_i32_0 = arith.constant 0 : i32
    return %arg0, %c0_i32 : i32, i32
  }
}

</mosaic_0001>

<bundles_post_ra>
// kernel: toy_model_forward.1
= control target key start
LH: loop header
LB: loop body
LE: loop exit
PB: predicated region body
PF: predicated region fallthrough
CT: control target
= control target key end

     0   :  { %v382_v1 = vmov 0.0   ;;  %vm383_vm0 = vmmov 0   ;;  %s484_s0 = inlined_call_operand.vmem [shape: bf16[8,128], index: 0, kind: input, shape index: {}]   ;;  %s485_s1 = inlined_call_operand.vmem [shape: bf16[128,128], index: 1, kind: input, shape index: {}]   ;;  %s486_s2 = inlined_call_operand.vmem [shape: f32[1,128], index: 2, kind: input, shape index: {}]   ;;  %s487_s3 = inlined_call_operand.vmem [shape: bf16[128,128], index: 3, kind: input, shape index: {}]   ;;  %s488_s4 = inlined_call_operand.vmem [shape: f32[1,128], index: 4, kind: input, shape index: {}]   ;;  %s489_s5 = inlined_call_operand.hbm [shape: f32[8,128], index: 5, kind: output, shape index: {}]  }
   0x1   :  { %v342_v0 = vld [vmem:[%s485_s1] sm:$0xff]   ;;  %299 = vmatprep.subr.bf16.mxu0 %v382_v1  ;;  %319 = vmatprep.subr.bf16.mxu1 %v382_v1  ;;  %v343_v2 = vld [vmem:[%s485_s1 + $0x8] sm:$0xff]   ;;  %v344_v3 = vld [vmem:[%s485_s1 + $0x10] sm:$0xff]  }
   0x2   :  { %300 = vmatpush3.bf16.msra.mxu0 %v342_v0  ;;  %315 = vmatprep.mubr.msk.bf16.mxu0 %vm383_vm0, %v382_v1  ;;  %v350_v4 = vld [vmem:[%s487_s3] sm:$0xff]   ;;  %v345_v5 = vld [vmem:[%s485_s1 + $0x18] sm:$0xff]   ;;  %v351_v6 = vld [vmem:[%s487_s3 + $0x8] sm:$0xff]  }
   0x3   :  { %301 = vmatprep.subr.bf16.mxu0 %v382_v1  ;;  %335 = vmatprep.mubr.msk.bf16.mxu1 %vm383_vm0, %v382_v1  ;;  %v346_v7 = vld [vmem:[%s485_s1 + $0x20] sm:$0xff]   ;;  %v352_v8 = vld [vmem:[%s487_s3 + $0x10] sm:$0xff]  }
   0x4   :  { %320 = vmatpush3.bf16.msra.mxu1 %v350_v4 }
   0x5   :  { %321 = vmatprep.subr.bf16.mxu1 %v382_v1 }
   0x6   :  { %302 = vmatpush3.bf16.msra.mxu0 %v343_v2 }
   0x7   :  { %303 = vmatprep.subr.bf16.mxu0 %v382_v1 }
   0x8   :  { %322 = vmatpush3.bf16.msra.mxu1 %v351_v6 }
   0x9   :  { %323 = vmatprep.subr.bf16.mxu1 %v382_v1 }
   0xa   :  { %304 = vmatpush3.bf16.msra.mxu0 %v344_v3 }
   0xb   :  { %305 = vmatprep.subr.bf16.mxu0 %v382_v1 }
   0xe   :  { %306 = vmatpush3.bf16.msra.mxu0 %v345_v5 }
   0xf   :  { %307 = vmatprep.subr.bf16.mxu0 %v382_v1 }
  0x10   :  { %10 = vsyncpa [#allocation3], 0  ;;  %v347_v9 = vld [vmem:[%s485_s1 + $0x28] sm:$0xff]   ;;  %324 = vmatpush3.bf16.msra.mxu1 %v352_v8  ;;  %v353_v10 = vld [vmem:[%s487_s3 + $0x18] sm:$0xff]   ;;  %s384_s29 = smov [#allocation2]  }
  0x11   :  { %325 = vmatprep.subr.bf16.mxu1 %v382_v1  ;;  %v348_v11 = vld [vmem:[%s485_s1 + $0x30] sm:$0xff]   ;;  %v354_v12 = vld [vmem:[%s487_s3 + $0x20] sm:$0xff]   ;;  %v349_v13 = vld [vmem:[%s485_s1 + $0x38] sm:$0xff]  }
  0x12   :  { %308 = vmatpush3.bf16.msra.mxu0 %v346_v7  ;;  %v355_v14 = vld [vmem:[%s487_s3 + $0x28] sm:$0xff]   ;;  %v22_v15 = vld [vmem:[%s484_s0] sm:$0xf]  ;;  %v356_v16 = vld [vmem:[%s487_s3 + $0x30] sm:$0xff]  }
  0x13   :  { %309 = vmatprep.subr.bf16.mxu0 %v382_v1  ;;  %v357_v17 = vld [vmem:[%s487_s3 + $0x38] sm:$0xff]   ;;  %v263_v18 = vld [vmem:[%s486_s2] ss:$0 sm:$0xff]  ;;  %s255_s3 = sshll.u32 %s384_s29, 4  ;;  %s256_s3 = int_to_ptr.vmem [resolvable:$true] %s255_s3 }
  0x14   :  { %326 = vmatpush3.bf16.msra.mxu1 %v353_v10  ;;  %v272_v26 = vld [vmem:[%s488_s4] ss:$0 sm:$0xff]  ;;  %s358_s2 = scalar_lea.vmem %s256_s3, 128  ;;  %p363_p1 = scmp.lt.s32.totalorder %s256_s3, %s256_s3 }
  0x15   :  { %327 = vmatprep.subr.bf16.mxu1 %v382_v1  ;;  %p359_p0 = scmp.ne.s32.totalorder %s256_s3, %s358_s2  ;;  %p364_p2 = scmp.lt.s32.totalorder %s358_s2, %s358_s2 }
  0x16   :  { %310 = vmatpush3.bf16.msra.mxu0 %v347_v9 }
  0x17   :  { %311 = vmatprep.subr.bf16.mxu0 %v382_v1  ;;  %p365_p3 = por %p364_p2, %p363_p1 }
  0x18   :  { %328 = vmatpush3.bf16.msra.mxu1 %v354_v12 }
  0x19   :  { %329 = vmatprep.subr.bf16.mxu1 %v382_v1  ;;  %p366_p4 = pnand %p365_p3, %p359_p0 }
  0x1a   :  { %312 = vmatpush3.bf16.msra.mxu0 %v348_v11 }
  0x1b   :  { %313 = vmatprep.subr.bf16.mxu0 %v382_v1 }
  0x1c   :  { %330 = vmatpush3.bf16.msra.mxu1 %v355_v14 }
  0x1d   :  { %331 = vmatprep.subr.bf16.mxu1 %v382_v1 }
  0x1e   :  { %314 = vmatpush3.bf16.msra.mxu0 %v349_v13 }
  0x20   :  { %332 = vmatpush3.bf16.msra.mxu1 %v356_v16 }
  0x21   :  { %316 = vmatmul.mubr.bf16.vlgmr.msra.gmra.mrb[0].mxu0 %v22_v15  ;;  %333 = vmatprep.subr.bf16.mxu1 %v382_v1 }
  0x24   :  { %334 = vmatpush3.bf16.msra.mxu1 %v357_v17 }
  0xf4   :  { %v128_v19 = vpop.f32.mrb[0].mxu0 }
  0xf5   :  { %v129_v20 = vadd.f32 %v263_v18, %v128_v19  ;;  %v317_v21 = vpop.f32.mrb[1].mxu0 }
  0xf6   :  { %v131_v22 = vpop.f32.mrb[2].mxu0 }
  0xf7   :  { %v134_v23 = vmax.f32 %v129_v20, 0.0  ;;  %v318_v24 = vpop.f32.mrb[3].mxu0 }
  0xf9   :  { %v135_v25 = vpack.c.bf16 %v134_v23, %v134_v23 }
  0xfb   :  { %336 = vmatmul.mubr.bf16.vlgmr.msra.gmra.mrb[0].mxu1 %v135_v25 }
 0x1ce   :  { %v241_v27 = vpop.f32.mrb[0].mxu1 }
 0x1cf   :  { %v242_v28 = vadd.f32 %v272_v26, %v241_v27  ;;  %v337_v29 = vpop.f32.mrb[1].mxu1 }
 0x1d0   :  { %v244_v30 = vpop.f32.mrb[2].mxu1 }
 0x1d1   :  { %v247_v31 = vmax.f32 %v242_v28, 0.0  ;;  %v338_v32 = vpop.f32.mrb[3].mxu1 }
 0x1d3   :  { %248 = vst [vmem:[#allocation2] sm:$0xff] %v247_v31 }
 0x1d4   :  { %369 = shalt.err (!%p366_p4)
}
 0x1d5   :  { %s370_s4 = scalar_lea.hbm %s489_s5, 128 }
 0x1d6   :  { %p371_p5 = scmp.ne.s32.totalorder %s489_s5, %s370_s4  ;;  %p374_p6 = scmp.lt.u32.totalorder %s370_s4, %s489_s5 }
 0x1d8   :  { %p376_p7 = pnand %p374_p6, %p371_p5 }
 0x1da   :  { %379 = shalt.err (!%p376_p7)
}
 0x1db   :  { %258 = dma.vmem_to_hbm [thread:$0]  %s256_s3, 128, %s489_s5, [#allocation3]  }
 0x1dc   :  { %380 = dma.done.wait [#allocation3], 128  }
 0x1dd   :  { %381 = vsyncadd [#allocation3], 4294967168 }
 0x1de   :  { %262 = vsyncpa [#allocation3], 1 }

</bundles_post_ra>
